<compile_context>
chip_gen: v7x
topology: tpu7x:2x2x1
jax: 0.10.0
libtpu: 0.0.40
codegen_flags: <defaults>
</compile_context>

<pallas_src>
import math
from functools import partial

import jax
import jax.numpy as jnp
from jax import lax
from jax.experimental import pallas as pl
from jax.experimental.pallas import tpu as pltpu


_VMEM = pl.BlockSpec(memory_space=pltpu.MemorySpace.VMEM)
_BF16 = jnp.bfloat16


def _round_up(x, m):
    return ((x + m - 1) // m) * m


# ----------------------------- Pallas kernels ------------------------------

def _embed_tokens_kernel(patches_ref, w_ref, b_ref, cls_ref, pos_ref, o_ref,
                         *, s_real):
    """Patch embedding + CLS prepend + positional encoding, one image.

    patches_ref is pre-shifted in the wrapper (row 0 and rows >= s_real are
    zero, rows 1..N hold the flattened patches), so one matmul produces the
    patch-token rows in place and a single aligned full-block store suffices.
    """
    emb = jnp.dot(patches_ref[...], w_ref[...],
                  preferred_element_type=jnp.float32) + b_ref[...]
    Sp, Dp = emb.shape
    row = lax.broadcasted_iota(jnp.int32, (Sp, Dp), 0)
    tok = jnp.where(row == 0, cls_ref[...] + pos_ref[...],
                    jnp.where(row < s_real, emb + pos_ref[...], 0.0))
    o_ref[...] = tok


def _encoder_stack_kernel(x_ref, ln1g_ref, ln1b_ref, wqkv_ref, bqkv_ref,
                          wo_ref, bo_ref, ln2g_ref, ln2b_ref, w1_ref, b1_ref,
                          w2_ref, b2_ref, o_ref, res_ref, *, num_heads,
                          d_real, s_real):
    """All encoder layers for one batch block; grid = (B//bB, L).

    The residual stream stays in the VMEM scratch `res_ref` across the inner
    L axis; HBM is touched only to read the tokens at l==0 and write them
    back at l==L-1.  Per-layer weights revolve via BlockSpec pipelining.
    """
    l = pl.program_id(1)

    @pl.when(l == 0)
    def _():
        res_ref[...] = x_ref[...]

    x3 = res_ref[...]                              # (bB, Sp, Dp) f32
    bB, Sp, Dp = x3.shape
    hp = Dp // num_heads                           # padded per-head dim
    hd = d_real // num_heads                       # real per-head dim
    inv_d = 1.0 / d_real
    eps = 1e-5
    scale = 1.0 / math.sqrt(hd)

    def layernorm(v, g, b):
        # Padded columns of v are exactly 0, so sums over Dp equal sums over
        # the real D; divide by real D.  gamma/beta padding is 0 so padded
        # output columns stay 0.
        mu = jnp.sum(v, axis=-1, keepdims=True) * inv_d
        ex2 = jnp.sum(v * v, axis=-1, keepdims=True) * inv_d
        var = jnp.maximum(ex2 - mu * mu, 0.0)
        return (v - mu) * lax.rsqrt(var + eps) * g + b

    # Batch the block's rows together so the MXU M dimension is bB*Sp.
    x = x3.reshape(bB * Sp, Dp)

    # --- LayerNorm 1 + multi-head self-attention (heads + batch batched) ---
    xn = layernorm(x, ln1g_ref[...], ln1b_ref[...])
    qkv = jnp.dot(xn.astype(_BF16), wqkv_ref[...],
                  preferred_element_type=jnp.float32) + bqkv_ref[...]
    # (bB, H, Sp, hp) layout for canonical batched matmuls on the MXU.
    q = qkv[:, 0 * Dp:1 * Dp].reshape(bB, Sp, num_heads, hp).transpose(0, 2, 1, 3)
    k = qkv[:, 1 * Dp:2 * Dp].reshape(bB, Sp, num_heads, hp).transpose(0, 2, 1, 3)
    v = qkv[:, 2 * Dp:3 * Dp].reshape(bB, Sp, num_heads, hp).transpose(0, 2, 1, 3)

    s = jnp.einsum('bhqd,bhkd->bhqk', q.astype(_BF16), k.astype(_BF16),
                   preferred_element_type=jnp.float32) * scale
    # Mask padded key positions (sequence is padded to a sublane multiple).
    kmask = lax.broadcasted_iota(jnp.int32, s.shape, 3) < s_real
    s = jnp.where(kmask, s, -1e30)
    s = s - jnp.max(s, axis=-1, keepdims=True)
    p = jnp.exp(s)
    p = p * pl.reciprocal(jnp.sum(p, axis=-1, keepdims=True), approx=True)

    attn = jnp.einsum('bhqk,bhkd->bhqd', p.astype(_BF16), v.astype(_BF16),
                      preferred_element_type=jnp.float32)
    attn = attn.transpose(0, 2, 1, 3).reshape(bB * Sp, Dp)
    attn = jnp.dot(attn.astype(_BF16), wo_ref[...],
                   preferred_element_type=jnp.float32) + bo_ref[...]
    x = x + attn                                    # residual

    # --- LayerNorm 2 + MLP (exact GELU) ---
    xn2 = layernorm(x, ln2g_ref[...], ln2b_ref[...])
    h1 = jnp.dot(xn2.astype(_BF16), w1_ref[...],
                 preferred_element_type=jnp.float32) + b1_ref[...]
    h1 = 0.5 * h1 * (1.0 + lax.erf(h1 * (1.0 / math.sqrt(2.0))))
    h2 = jnp.dot(h1.astype(_BF16), w2_ref[...],
                 preferred_element_type=jnp.float32) + b2_ref[...]
    x_new = (x + h2).reshape(bB, Sp, Dp)            # residual

    res_ref[...] = x_new                            # stays resident in VMEM

    @pl.when(l == pl.num_programs(1) - 1)
    def _():
        o_ref[...] = x_new                          # single HBM writeback


def _head_kernel(cls_ref, w1_ref, b1_ref, w2_ref, b2_ref, o_ref):
    """Linear -> Tanh -> Linear head on the pre-sliced CLS tokens (B, Dp)."""
    h = jnp.dot(cls_ref[...].astype(_BF16), w1_ref[...],
                preferred_element_type=jnp.float32) + b1_ref[...]
    h = jnp.tanh(h)
    o_ref[...] = jnp.dot(h.astype(_BF16), w2_ref[...],
                         preferred_element_type=jnp.float32) + b2_ref[...]


# ------------------------------ Model glue ----------------------------------

def init_params(key, C, P, D, num_heads, num_encoders, mlp_ratio, num_classes,
                num_patches):
    """Logical (unpadded, f32) parameters matching the PyTorch module."""
    S = num_patches + 1
    hidden = mlp_ratio * D
    keys = jax.random.split(key, 6 + num_encoders)

    def nrm(k, shape, scale=0.02):
        return scale * jax.random.normal(k, shape, jnp.float32)

    params = {
        "patch_w": nrm(keys[0], (C * P * P, D)),
        "patch_b": jnp.zeros((1, D), jnp.float32),
        "cls": nrm(keys[1], (1, 1, D)),
        "pos": nrm(keys[2], (1, S, D)),
        "head_w1": nrm(keys[3], (D, D)),
        "head_b1": jnp.zeros((1, D), jnp.float32),
        "head_w2": nrm(keys[4], (D, num_classes)),
        "head_b2": jnp.zeros((1, num_classes), jnp.float32),
        "layers": [],
    }
    for i in range(num_encoders):
        lk = jax.random.split(keys[6 + i], 4)
        params["layers"].append({
            "ln1_g": jnp.ones((1, D), jnp.float32),
            "ln1_b": jnp.zeros((1, D), jnp.float32),
            "w_qkv": nrm(lk[0], (D, 3 * D)),
            "b_qkv": jnp.zeros((1, 3 * D), jnp.float32),
            "w_o": nrm(lk[1], (D, D)),
            "b_o": jnp.zeros((1, D), jnp.float32),
            "ln2_g": jnp.ones((1, D), jnp.float32),
            "ln2_b": jnp.zeros((1, D), jnp.float32),
            "w1": nrm(lk[2], (D, hidden)),
            "b1": jnp.zeros((1, hidden), jnp.float32),
            "w2": nrm(lk[3], (hidden, D)),
            "b2": jnp.zeros((1, D), jnp.float32),
        })
    return params


def pad_params(params, D, num_heads):
    """Zero-pad to lane-dense layouts, stack layer weights along a new L axis.

    q/k/v columns and w_o rows are padded *per head* so the in-kernel head
    split of the padded dim Dp stays aligned with the logical head split
    (no-op at real ViT scale where D is already a multiple of 128).
    Correctness of the LayerNorm/residual math requires every padded column
    to be exactly zero (weights, biases, gamma, beta) — preserved here.
    """
    Dp = _round_up(D, 128)
    hd = D // num_heads
    hp = Dp // num_heads
    hidden = params["layers"][0]["w1"].shape[1]
    Hdp = _round_up(hidden, 128)
    num_classes = params["head_w2"].shape[1]
    Cp = _round_up(num_classes, 128)
    K = params["patch_w"].shape[0]
    S = params["pos"].shape[1]
    Sp = _round_up(S, 8)          # sublane-align the sequence (keys masked)

    def pad2(a, shape):
        out = jnp.zeros(shape, a.dtype)
        return out.at[:a.shape[0], :a.shape[1]].set(a)

    def pad_qkv_w(w):                           # (D, 3D) -> (Dp, 3Dp)
        out = jnp.zeros((Dp, 3 * Dp), w.dtype)
        for part in range(3):                   # q, k, v sections
            for h in range(num_heads):
                src = w[:, part * D + h * hd: part * D + (h + 1) * hd]
                out = out.at[:D, part * Dp + h * hp:
                             part * Dp + h * hp + hd].set(src)
        return out

    def pad_qkv_b(b):                           # (1, 3D) -> (1, 3Dp)
        out = jnp.zeros((1, 3 * Dp), b.dtype)
        for part in range(3):
            for h in range(num_heads):
                src = b[:, part * D + h * hd: part * D + (h + 1) * hd]
                out = out.at[:, part * Dp + h * hp:
                             part * Dp + h * hp + hd].set(src)
        return out

    def pad_wo(w):                              # rows are concat-of-heads
        out = jnp.zeros((Dp, Dp), w.dtype)
        for h in range(num_heads):
            out = out.at[h * hp: h * hp + hd, :D].set(
                w[h * hd:(h + 1) * hd, :])
        return out

    def pad_layer(l):
        return {
            "ln1_g": pad2(l["ln1_g"], (1, Dp)),
            "ln1_b": pad2(l["ln1_b"], (1, Dp)),
            "w_qkv": pad_qkv_w(l["w_qkv"]).astype(_BF16),
            "b_qkv": pad_qkv_b(l["b_qkv"]),
            "w_o": pad_wo(l["w_o"]).astype(_BF16),
            "b_o": pad2(l["b_o"], (1, Dp)),
            "ln2_g": pad2(l["ln2_g"], (1, Dp)),
            "ln2_b": pad2(l["ln2_b"], (1, Dp)),
            "w1": pad2(l["w1"], (Dp, Hdp)).astype(_BF16),
            "b1": pad2(l["b1"], (1, Hdp)),
            "w2": pad2(l["w2"], (Hdp, Dp)).astype(_BF16),
            "b2": pad2(l["b2"], (1, Dp)),
        }

    layer_pads = [pad_layer(l) for l in params["layers"]]
    enc = {k: jnp.stack([lp[k] for lp in layer_pads], axis=0)
           for k in layer_pads[0]}               # each: (L, rows, cols)

    return {
        "patch_w": pad2(params["patch_w"], (K, Dp)).astype(_BF16),
        "patch_b": pad2(params["patch_b"], (1, Dp)),
        "cls": pad2(params["cls"][0], (1, Dp)),
        "pos": pad2(params["pos"][0], (Sp, Dp)),
        "head_w1": pad2(params["head_w1"], (Dp, Dp)).astype(_BF16),
        "head_b1": pad2(params["head_b1"], (1, Dp)),
        "head_w2": pad2(params["head_w2"], (Dp, Cp)).astype(_BF16),
        "head_b2": pad2(params["head_b2"], (1, Cp)),
        "num_classes": num_classes,
        "enc": enc,
    }


def vit_forward(x_nchw, pp, patch_size, num_heads, d_real, block_b=2):
    """x_nchw: (B, C, H, W) float32 — matches the PyTorch forward layout."""
    B, C, H, W = x_nchw.shape
    P = patch_size
    Hp_, Wp_ = H // P, W // P
    N = Hp_ * Wp_
    S = N + 1
    K = C * P * P
    Sp, Dp = pp["pos"].shape
    Cp = pp["head_w2"].shape[1]
    enc = pp["enc"]
    L = enc["w_qkv"].shape[0]
    Hdp = enc["w1"].shape[2]
    hp = Dp // num_heads
    assert B % block_b == 0

    # Conv2d(kernel=stride=P) == per-patch flatten in (c, ph, pw) order +
    # matmul.  Cast to bf16 (matmul operand dtype anyway) to halve patch DMA;
    # pre-shift by one row (row 0 reserved for CLS) and zero-pad rows >= S so
    # the embed kernel can do a single aligned store.
    patches = (x_nchw.reshape(B, C, Hp_, P, Wp_, P)
               .transpose(0, 2, 4, 1, 3, 5)
               .reshape(B, N, K)).astype(_BF16)
    patches = jnp.zeros((B, Sp, K), _BF16).at[:, 1:S, :].set(patches)

    # Fused: patch embedding + CLS prepend + positional encoding.
    tokens = pl.pallas_call(
        partial(_embed_tokens_kernel, s_real=S),
        out_shape=jax.ShapeDtypeStruct((B, Sp, Dp), jnp.float32),
        grid=(B,),
        in_specs=[
            pl.BlockSpec((pl.Squeezed(), Sp, K), lambda b: (b, 0, 0)),
            _VMEM, _VMEM, _VMEM, _VMEM,     # weights resident, not revolved
        ],
        out_specs=pl.BlockSpec((pl.Squeezed(), Sp, Dp), lambda b: (b, 0, 0)),
        compiler_params=pltpu.CompilerParams(
            dimension_semantics=("parallel",)),
    )(patches, pp["patch_w"], pp["patch_b"], pp["cls"], pp["pos"])

    # Encoder stack: ONE pallas_call over grid (B//block_b parallel,
    # L arbitrary).  Residual stream lives in VMEM scratch across L; layer
    # weights are pipelined by BlockSpec along L.  block_b trades MXU row
    # fill against keeping >=2 parallel batch blocks for v7x's two cores.
    w_order = ["ln1_g", "ln1_b", "w_qkv", "b_qkv", "w_o", "b_o",
               "ln2_g", "ln2_b", "w1", "b1", "w2", "b2"]
    w_ops = [enc[k] for k in w_order]

    def _x_spec():
        return pl.BlockSpec((block_b, Sp, Dp), lambda b, l: (b, 0, 0))

    def _w_spec(a):
        nd = a.ndim
        return pl.BlockSpec((pl.Squeezed(),) + a.shape[1:],
                            lambda b, l: (l,) + (0,) * (nd - 1))

    flops = int(2 * B * L * Sp * Dp * (3 * Dp + Dp + 2 * Hdp)
                + 4 * B * L * num_heads * Sp * Sp * hp)
    transc = int(B * L * (num_heads * Sp * Sp + Sp * Hdp))
    bytes_acc = int(2 * B * Sp * Dp * 4
                    + sum(a.size * a.dtype.itemsize for a in w_ops))

    tokens = pl.pallas_call(
        partial(_encoder_stack_kernel, num_heads=num_heads, d_real=d_real,
                s_real=S),
        out_shape=jax.ShapeDtypeStruct((B, Sp, Dp), jnp.float32),
        grid=(B // block_b, L),
        in_specs=[_x_spec()] + [_w_spec(a) for a in w_ops],
        out_specs=_x_spec(),
        scratch_shapes=[pltpu.VMEM((block_b, Sp, Dp), jnp.float32)],
        compiler_params=pltpu.CompilerParams(
            dimension_semantics=("parallel", "arbitrary"),
            vmem_limit_bytes=48 * 1024 * 1024),   # > v5e 16MiB default, < v7x 64MiB
        cost_estimate=pl.CostEstimate(flops=flops, transcendentals=transc,
                                      bytes_accessed=bytes_acc),
    )(tokens, *w_ops)

    # Only the CLS row enters the head kernel (no full-token DMA).
    cls_tok = tokens[:, 0, :]                       # (B, Dp)
    head_out = pl.pallas_call(
        _head_kernel,
        out_shape=jax.ShapeDtypeStruct((B, Cp), jnp.float32),
        in_specs=[_VMEM] * 5,
        out_specs=_VMEM,
    )(cls_tok, pp["head_w1"], pp["head_b1"], pp["head_w2"], pp["head_b2"])

    return head_out[:, :pp["num_classes"]]


# --------------------------------- Main --------------------------------------

if __name__ == "__main__":
    B, C, H, W = 2, 4, 16, 16
    patch_size = 4
    embed_dim = 32
    num_heads = 2
    num_encoders = 2
    mlp_ratio = 4
    num_classes = 10
    num_patches = (H // patch_size) * (W // patch_size)    # 16 -> seq = 17

    key = jax.random.PRNGKey(0)
    k_x, k_p = jax.random.split(key)
    x = jax.random.normal(k_x, (B, C, H, W), jnp.float32)

    params = init_params(k_p, C, patch_size, embed_dim, num_heads,
                         num_encoders, mlp_ratio, num_classes, num_patches)
    padded = pad_params(params, embed_dim, num_heads)

    out = vit_forward(x, padded, patch_size, num_heads, embed_dim, block_b=2)
    out = jax.block_until_ready(out)
    assert out.shape == (B, num_classes) and out.dtype == jnp.float32
    assert bool(jnp.all(jnp.isfinite(out)))
    print("KERNEL_OK")
</pallas_src>

<mosaic_0001>
module attributes {stable_mosaic.version = 11 : i64} {
  func.func @_embed_tokens_kernel(%arg0: i32, %arg1: memref<1x24x64xbf16, #tpu.memory_space<vmem>>, %arg2: memref<64x128xbf16, #tpu.memory_space<vmem>>, %arg3: memref<1x128xf32, #tpu.memory_space<vmem>>, %arg4: memref<1x128xf32, #tpu.memory_space<vmem>>, %arg5: memref<24x128xf32, #tpu.memory_space<vmem>>, %arg6: memref<1x24x128xf32, #tpu.memory_space<vmem>>) attributes {dimension_semantics = [#tpu.dimension_semantics<parallel>], iteration_bounds = array<i64: 2>, scalar_prefetch = 0 : i64, scratch_operands = 0 : i64, tpu.core_type = #tpu.core_type<tc>, window_params = [{transform_indices = @transform_0, window_bounds = array<i64: 1, 24, 64>}, {pipeline_mode = #tpu.pipeline_mode<synchronous>, transform_indices = @transform_1, window_bounds = array<i64: 64, 128>}, {pipeline_mode = #tpu.pipeline_mode<synchronous>, transform_indices = @transform_2, window_bounds = array<i64: 1, 128>}, {pipeline_mode = #tpu.pipeline_mode<synchronous>, transform_indices = @transform_3, window_bounds = array<i64: 1, 128>}, {pipeline_mode = #tpu.pipeline_mode<synchronous>, transform_indices = @transform_4, window_bounds = array<i64: 24, 128>}, {transform_indices = @transform_5, window_bounds = array<i64: 1, 24, 128>}]} {
    %c0 = arith.constant 0 : index
    %c0_0 = arith.constant 0 : index
    %c0_1 = arith.constant 0 : index
    %0 = vector.load %arg1[%c0, %c0_0, %c0_1] : memref<1x24x64xbf16, #tpu.memory_space<vmem>>, vector<1x24x64xbf16>
    %1 = vector.shape_cast %0 : vector<1x24x64xbf16> to vector<24x64xbf16>
    %c0_2 = arith.constant 0 : index
    %c0_3 = arith.constant 0 : index
    %2 = vector.load %arg2[%c0_2, %c0_3] : memref<64x128xbf16, #tpu.memory_space<vmem>>, vector<64x128xbf16>
    %cst = arith.constant dense<0.000000e+00> : vector<24x128xf32>
    %3 = tpu.matmul %1, %2, %cst {dimension_numbers = #tpu.dot_dimension_numbers<[1], [0], [0], [1], [0, 0, 1, 1], [], []>} : vector<24x64xbf16>, vector<64x128xbf16>, vector<24x128xf32> -> vector<24x128xf32>
    %c0_4 = arith.constant 0 : index
    %c0_5 = arith.constant 0 : index
    %4 = vector.load %arg3[%c0_4, %c0_5] : memref<1x128xf32, #tpu.memory_space<vmem>>, vector<1x128xf32>
    %5 = vector.broadcast %4 : vector<1x128xf32> to vector<24x128xf32>
    %6 = arith.addf %3, %5 : vector<24x128xf32>
    %7 = tpu.iota {dimensions = array<i32: 0>} : vector<24x128xi32>
    %c0_i32 = arith.constant 0 : i32
    %8 = vector.broadcast %c0_i32 : i32 to vector<24x128xi32>
    %9 = arith.cmpi eq, %7, %8 : vector<24x128xi32>
    %c0_6 = arith.constant 0 : index
    %c0_7 = arith.constant 0 : index
    %10 = vector.load %arg4[%c0_6, %c0_7] : memref<1x128xf32, #tpu.memory_space<vmem>>, vector<1x128xf32>
    %c0_8 = arith.constant 0 : index
    %c0_9 = arith.constant 0 : index
    %11 = vector.load %arg5[%c0_8, %c0_9] : memref<24x128xf32, #tpu.memory_space<vmem>>, vector<24x128xf32>
    %12 = vector.broadcast %10 : vector<1x128xf32> to vector<24x128xf32>
    %13 = arith.addf %12, %11 : vector<24x128xf32>
    %c17_i32 = arith.constant 17 : i32
    %14 = vector.broadcast %c17_i32 : i32 to vector<24x128xi32>
    %15 = arith.cmpi slt, %7, %14 : vector<24x128xi32>
    %c0_10 = arith.constant 0 : index
    %c0_11 = arith.constant 0 : index
    %16 = vector.load %arg5[%c0_10, %c0_11] : memref<24x128xf32, #tpu.memory_space<vmem>>, vector<24x128xf32>
    %17 = arith.addf %6, %16 : vector<24x128xf32>
    %cst_12 = arith.constant 0.000000e+00 : f32
    %18 = vector.broadcast %cst_12 : f32 to vector<24x128xf32>
    %19 = arith.select %15, %17, %18 : vector<24x128xi1>, vector<24x128xf32>
    %20 = arith.select %9, %13, %19 : vector<24x128xi1>, vector<24x128xf32>
    %c0_13 = arith.constant 0 : index
    %c0_14 = arith.constant 0 : index
    %c0_15 = arith.constant 0 : index
    %21 = vector.load %arg6[%c0_13, %c0_14, %c0_15] : memref<1x24x128xf32, #tpu.memory_space<vmem>>, vector<1x24x128xf32>
    %22 = vector.shape_cast %21 : vector<1x24x128xf32> to vector<24x128xf32>
    %23 = vector.shape_cast %20 : vector<24x128xf32> to vector<1x24x128xf32>
    tpu.vector_store %arg6[%c0_13, %c0_14, %c0_15], %23 {strides = array<i32>} : memref<1x24x128xf32, #tpu.memory_space<vmem>>, vector<1x24x128xf32>,
    return
  }
  func.func @transform_0(%arg0: i32) -> (i32, i32, i32) {
    %c0_i32 = arith.constant 0 : i32
    %c0_i32_0 = arith.constant 0 : i32
    %c0_i32_1 = arith.constant 0 : i32
    return %arg0, %c0_i32, %c0_i32_0 : i32, i32, i32
  }
  func.func @transform_1(%arg0: i32) -> (i32, i32) {
    %c0_i32 = arith.constant 0 : i32
    %c0_i32_0 = arith.constant 0 : i32
    %c0_i32_1 = arith.constant 0 : i32
    return %c0_i32, %c0_i32_0 : i32, i32
  }
  func.func @transform_2(%arg0: i32) -> (i32, i32) {
    %c0_i32 = arith.constant 0 : i32
    %c0_i32_0 = arith.constant 0 : i32
    %c0_i32_1 = arith.constant 0 : i32
    return %c0_i32, %c0_i32_0 : i32, i32
  }
  func.func @transform_3(%arg0: i32) -> (i32, i32) {
    %c0_i32 = arith.constant 0 : i32
    %c0_i32_0 = arith.constant 0 : i32
    %c0_i32_1 = arith.constant 0 : i32
    return %c0_i32, %c0_i32_0 : i32, i32
  }
  func.func @transform_4(%arg0: i32) -> (i32, i32) {
    %c0_i32 = arith.constant 0 : i32
    %c0_i32_0 = arith.constant 0 : i32
    %c0_i32_1 = arith.constant 0 : i32
    return %c0_i32, %c0_i32_0 : i32, i32
  }
  func.func @transform_5(%arg0: i32) -> (i32, i32, i32) {
    %c0_i32 = arith.constant 0 : i32
    %c0_i32_0 = arith.constant 0 : i32
    %c0_i32_1 = arith.constant 0 : i32
    return %arg0, %c0_i32, %c0_i32_0 : i32, i32, i32
  }
}

</mosaic_0001>

<bundles_post_ra>
// kernel: tpu_custom_call.1
= control target key start
LH: loop header
LB: loop body
LE: loop exit
PB: predicated region body
PF: predicated region fallthrough
CT: control target
= control target key end

     0   :  { %10 = vsyncpa [#allocation3], 0  ;;  %s1088_s0 = inlined_call_operand.hbm [shape: bf16[2,24,64], index: 0, kind: input, shape index: {}]   ;;  %s1089_s1 = inlined_call_operand.hbm [shape: bf16[64,128], index: 1, kind: input, shape index: {}]   ;;  %s1090_s2 = inlined_call_operand.vmem [shape: f32[1,128], index: 2, kind: input, shape index: {}]   ;;  %s1091_s3 = inlined_call_operand.vmem [shape: f32[1,128], index: 3, kind: input, shape index: {}]   ;;  %s1092_s4 = inlined_call_operand.hbm [shape: f32[24,128], index: 4, kind: input, shape index: {}]   ;;  %s1093_s5 = inlined_call_operand.hbm [shape: f32[2,24,128], index: 5, kind: output, shape index: {}]  }
   0x1   :  { %12 = vsyncpa [#allocation3 + $0x1], 0 }
   0x2   :  { %13 = vsyncpa [#allocation6], 0 }
   0x3   :  { %14 = vsyncpa [#allocation4], 0 }
   0x4   :  { %16 = vsyncpa [#allocation4 + $0x1], 0  ;;  %s841_s18 = smov 0   ;;  %s843_s19 = smov 0  }
   0x5   :  { %s845_s20 = smov 0   ;;  %s847_s21 = smov 0  }
   0x6 LB: > { %s862_s22 = sadd.s32 4294967295, %s799_s21   ;;  %s519_s23 = sadd.s32 4294967294, %s799_s21   ;;  %s799_s21 = sphi %s847_s21, %s1115_s21   ;;  %s795_s20 = sphi %s845_s20, %s1114_s20   ;;  %s791_s19 = sphi %s843_s19, %s1113_s19   ;;  %s787_s18 = sphi %s841_s18, %s1112_s18  }
   0x7   : > { %p42_p0 = scmp.ne.s32.totalorder %s791_s19, %s787_s18  ;;  %p1094_p1 = scmp.eq.s32.totalorder %s862_s22, 0 }
   0x8   : > { %p156_p3 = scmp.eq.s32.totalorder %s519_s23, 1  ;;  %p520_p5 = scmp.ge.s32.totalorder %s799_s21, 1 }
   0x9   : > { %p871_p4 = por %p1094_p1, %p42_p0  ;;  %p163_p7 = scmp.lt.s32.totalorder %s799_s21, 3 }
   0xa   : > { %p876_p6 = por %p156_p3, %p42_p0  ;;  %s801_s27 = smov [#allocation5]  }
   0xb   : > { %s1098_s24 = scalar_select %p871_p4, 1, 0 }
   0xc   : > { %s1099_s25 = scalar_select %p876_p6, 1, 0 }
   0xd   : > { %p881_p8 = pnand %p520_p5, %p163_p7  ;;  %s175_s28 = sshll.u32 %s801_s27, 4  ;;  %s885_s28 = int_to_ptr.vmem [resolvable:$true] %s175_s28 }
   0xe   : > { %s802_s30 = smov [#allocation7]   ;;  %s643_s9 = scalar_lea.hbm %s1089_s1, 512 }
   0xf   : > { %p576_p9 = pneg %p881_p8  ;;  %s194_s6 = sshll.u32 %s802_s30, 4  ;;  %s896_s6 = int_to_ptr.vmem [resolvable:$true] %s194_s6 }
  0x10   : > { %p644_p12 = scmp.ne.s32.totalorder %s1089_s1, %s643_s9  ;;  %p650_p5 = scmp.lt.u32.totalorder %s643_s9, %s1089_s1 }
  0x11   : > { %p892_p11 = pnand %p576_p9, %p1094_p1 }
  0x13   : > { %p645_p13 = pneg %p892_p11 }
  0x15   : > { %p646_p0 = pnand %p645_p13, %p644_p12 }
  0x17   : > { %p647_p3 = pneg %p646_p0 }
  0x19   : > { %p652_p7 = pnand %p650_p5, %p647_p3 }
  0x1b   : > { %655 = shalt.err (!%p652_p7)
}
  0x1c   : > { %s656_s14 = scalar_lea.vmem %s885_s28, 512  ;;  %p664_p2 = scmp.lt.s32.totalorder %s885_s28, %s885_s28 }
  0x1d   : > { %p657_p9 = scmp.ne.s32.totalorder %s885_s28, %s656_s14  ;;  %p665_p12 = scmp.lt.s32.totalorder %s656_s14, %s656_s14 }
  0x1f   : > { %p659_p10 = pnand %p657_p9, %p645_p13  ;;  %p666_p0 = por %p665_p12, %p664_p2 }
  0x21   : > { %p660_p1 = pneg %p659_p10 }
  0x23   : > { %p667_p6 = pnand %p666_p0, %p660_p1 }
  0x25   : > { %670 = shalt.err (!%p667_p6)
}
  0x26   : > { %s1095_s15 = smov 64   ;;  %s804_s16 = smov 4  }
  0x27   : > { %579 = dma.hbm_to_vmem [thread:$0]  (!%p892_p11), %s1089_s1, 512, %s885_s28, [#allocation6], %s1095_s15, %s1095_s15, %s804_s16  }
  0x28   : > { %s671_s7 = scalar_lea.hbm %s1092_s4, 384 }
  0x29   : > { %p672_p1 = scmp.ne.s32.totalorder %s1092_s4, %s671_s7  ;;  %p678_p10 = scmp.lt.u32.totalorder %s671_s7, %s1092_s4 }
  0x2b   : > { %p674_p2 = pnand %p672_p1, %p645_p13 }
  0x2d   : > { %p675_p6 = pneg %p674_p2 }
  0x2f   : > { %p680_p3 = pnand %p678_p10, %p675_p6 }
  0x31   : > { %683 = shalt.err (!%p680_p3)
}
  0x32   : > { %s684_s28 = scalar_lea.vmem %s896_s6, 384  ;;  %p692_p12 = scmp.lt.s32.totalorder %s896_s6, %s896_s6 }
  0x33   : > { %p685_p5 = scmp.ne.s32.totalorder %s896_s6, %s684_s28  ;;  %p693_p0 = scmp.lt.s32.totalorder %s684_s28, %s684_s28 }
  0x35   : > { %p687_p7 = pnand %p685_p5, %p645_p13  ;;  %p694_p1 = por %p693_p0, %p692_p12 }
  0x37   : > { %p688_p9 = pneg %p687_p7 }
  0x39   : > { %p695_p2 = pnand %p694_p1, %p688_p9 }
  0x3b   : > { %698 = shalt.err (!%p695_p2)
}
  0x3c   : > { %s805_s12 = smov 128   ;;  %s806_s13 = smov 8  }
  0x3d   : > { %582 = dma.hbm_to_vmem [thread:$0]  (!%p892_p11), %s1092_s4, 384, %s896_s6, [#allocation6], %s805_s12, %s805_s12, %s806_s13  }
  0x3e   : > { %s954_s23 = sadd.s32 1, %s799_s21   ;;  %s29_s30 = sadd.s32 1, %s795_s20 }
  0x3f   : > { %s26_s27 = ssub.s32 %s799_s21, %s954_s23  ;;  %p36_p6 = scmp.ne.s32.totalorder %s795_s20, %s791_s19 }
  0x40   : > { %p27_p13 = scmp.eq.s32.totalorder %s26_s27, 0  ;;  %p37_p10 = scmp.eq.s32.totalorder %s799_s21, 0 }
  0x41   : > { %p1102_p5 = scmp.eq.s32.totalorder %s862_s22, 1  ;;  %p593_p9 = scmp.lt.s32.totalorder %s799_s21, 2 }
  0x42   : > { %s963_s7 = scalar_select %p27_p13, %s795_s20, %s29_s30  }
  0x43   : > { %p38_p3 = por %p37_p10, %p36_p6  ;;  %p967_p7 = por %p1102_p5, %p36_p6 }
  0x44   : > { %s208_s29 = sand.u32 1, %s795_s20   ;;  %s560_s6 = smul.u32 192, %s799_s21 }
  0x45   : > { %s1103_s8 = scalar_select %p967_p7, 1, 0 }
  0x46   : > { %s559_s9 = smul.u32 12, %s208_s29  ;;  %p974_p11 = pnand %p593_p9, %p38_p3 }
  0x47   : > { %s981_s12 = scalar_lea.hbm %s1088_s0, %s560_s6  ;;  %s985_s17 = scalar_lea.sflag [#allocation3], %s208_s29 }
  0x48   : > { %s212_s13 = scalar_lea.vmem [#allocation2], %s559_s9  ;;  %s699_s27 = scalar_lea.hbm %s981_s12, 192 }
  0x49   : > { %s219_s14 = sshll.u32 %s212_s13, 4  ;;  %p700_p12 = scmp.ne.s32.totalorder %s981_s12, %s699_s27  ;;  %s983_s14 = int_to_ptr.vmem [resolvable:$true] %s219_s14 }
  0x4a   : > { %p701_p0 = pneg %p974_p11  ;;  %s704_s11 = scalar_lea.hbm %s1088_s0, 384 }
  0x4b   : > { %p705_p13 = scmp.lt.u32.totalorder %s981_s12, %s1088_s0  ;;  %p706_p6 = scmp.lt.u32.totalorder %s704_s11, %s699_s27 }
  0x4c   : > { %p702_p1 = pnand %p701_p0, %p700_p12  ;;  %p708_p3 = scmp.lt.u32.totalorder %s699_s27, %s981_s12 }
  0x4d   : > { %p707_p10 = por %p706_p6, %p705_p13 }
  0x4e   : > { %p703_p2 = pneg %p702_p1 }
  0x4f   : > { %p709_p5 = por %p708_p3, %p707_p10 }
  0x51   : > { %p710_p9 = pnand %p709_p5, %p703_p2 }
  0x53   : > { %713 = shalt.err (!%p710_p9)
}
  0x54   : > { %s714_s29 = scalar_lea.vmem %s983_s14, 192  ;;  %s807_s9 = smov [#allocation2]  }
  0x55   : > { %p715_p12 = scmp.ne.s32.totalorder %s983_s14, %s714_s29  ;;  %s719_s13 = sshll.u32 %s807_s9, 4  ;;  %s720_s13 = int_to_ptr.vmem [resolvable:$false] %s719_s13 }
  0x56   : > { %s721_s15 = scalar_lea.vmem %s720_s13, 384  ;;  %p722_p4 = scmp.lt.s32.totalorder %s983_s14, %s720_s13 }
  0x57   : > { %p717_p1 = pnand %p715_p12, %p701_p0  ;;  %p723_p13 = scmp.lt.s32.totalorder %s721_s15, %s714_s29 }
  0x59   : > { %p718_p7 = pneg %p717_p1  ;;  %p724_p6 = por %p723_p13, %p722_p4 }
  0x5b   : > { %p725_p10 = pnand %p724_p6, %p718_p7 }
  0x5d   : > { %728 = shalt.err (!%p725_p10)
}
  0x5e   : > { %s1105_s27 = smov 64   ;;  %231 = sbr.rel (%p881_p8) target bundleno = 356 (0x164), region = 40 }
  0x5f   : > { %586 = dma.hbm_to_vmem [thread:$0]  (!%p974_p11), %s981_s12, 192, %s983_s14, %s985_s17, %s1105_s27, %s1105_s27, %s804_s16  }
  0x60   : > { %s1019_s30 = sand.u32 (!%p881_p8), 1, %s791_s19   ;;  %p1106_p4 = scmp.ne.s32.totalorder (!%p881_p8), %s1098_s24, 0 }
  0x61   : > { %s561_s6 = smul.u32 (!%p881_p8), 12, %s1019_s30  ;;  %s234_s11 = scalar_lea.sflag (!%p881_p8), [#allocation3], %s1019_s30 }
  0x63   : > { %s237_s28 = scalar_lea.vmem (!%p881_p8), [#allocation2], %s561_s6 }
  0x65   : > { %774 = dma.done.wait (%p1106_p4), %s234_s11, 192  }
  0x66   : > { %776 = vsyncadd (%p1106_p4), %s234_s11, 4294967104  ;;  %p1107_p7 = scmp.eq.s32.totalorder %s862_s22, 0 }
  0x68   : > { %778 = dma.done.wait (%p1107_p7), [#allocation6], 896   ;;  %p1108_p11 = pmov %p1107_p7 }
  0x69   : > { %v637_v0 = vld [vmem:[#allocation5] sm:$0xff]   ;;  %v638_v1 = vld [vmem:[#allocation5 + $0x8] sm:$0xff]   ;;  %v639_v2 = vld [vmem:[#allocation5 + $0x10] sm:$0xff]   ;;  %vm323_vm0 = vcmask 523264   ;;  %v378_v6 = vlaneseq  ;;  %s562_s24 = smul.u32 24, %s1019_s30  ;;  %s414_s15 = scalar_lea.sflag [#allocation4], %s1019_s30 }
  0x6a   : > { %780 = vsyncadd (%p1108_p11), [#allocation6], 4294966400  ;;  %547 = vmatprep.subr.bf16.mxu0 %v637_v0  ;;  %v641_v3 = vld [vmem:[%s237_s28] sm:$0xff]   ;;  %v642_v5 = vld [vmem:[%s237_s28 + $0x8] ss:$0 sps:$4 sm:$0xff]   ;;  %s563_s29 = smul.u32 384, %s862_s22 }
  0x6b   : > { %548 = vmatpush3.bf16.msra.mxu0 %v637_v0  ;;  %555 = vmatprep.mubr.msk.bf16.mxu0 %vm323_vm0, %v641_v3  ;;  %v640_v4 = vld [vmem:[#allocation5 + $0x18] sm:$0xff]   ;;  %v379_v7 = vshrl.u32 %v378_v6, 7  ;;  %v528_v8 = vld [vmem:[%s1090_s2] ss:$0 sm:$0xff]  ;;  %v386_v11 = vld [vmem:[#allocation7] sm:$0xff]  ;;  %s271_s14 = scalar_lea.vmem [#allocation8], %s562_s24 }
  0x6c   : > { %549 = vmatprep.subr.bf16.mxu0 %v638_v1  ;;  %v537_v10 = vld [vmem:[%s1091_s3] ss:$0 sm:$0xff]  ;;  %v388_v13 = vld [vmem:[#allocation7 + $0x10] sm:$0xff]  ;;  %s427_s17 = sshll.u32 %s271_s14, 4  ;;  %s1044_s22 = scalar_lea.hbm %s1093_s5, %s563_s29  ;;  %s1039_s17 = int_to_ptr.vmem [resolvable:$true] %s427_s17 }
  0x6d   : > { %v381_v9 = vadd.s32 16, %v379_v7  ;;  %v395_v17 = vadd.f32 %v537_v10, %v386_v11  ;;  %vm382_vm2 = vcmp.eq.s32.totalorder %v379_v7, 0  ;;  %v387_v21 = vld [vmem:[#allocation7 + $0x8] sm:$0xff]  ;;  %s729_s27 = scalar_lea.vmem %s1039_s17, 384  ;;  %p1109_p0 = scmp.ne.s32.totalorder %s1103_s8, 0 }
  0x6e   : > { %p730_p8 = scmp.ne.s32.totalorder %s1039_s17, %s729_s27  ;;  %s808_s6 = smov [#allocation8]  }
  0x6f   : > { %550 = vmatpush3.bf16.msra.mxu0 %v638_v1  ;;  %vm400_vm1 = vcmp.lt.s32.totalorder %v381_v9, 17  ;;  %s733_s11 = sshll.u32 %s808_s6, 4  ;;  %s734_s11 = int_to_ptr.vmem [resolvable:$false] %s733_s11 }
  0x70   : > { %551 = vmatprep.subr.bf16.mxu0 %v639_v2  ;;  %p731_p2 = pnand %p730_p8, %p1109_p0  ;;  %s735_s28 = scalar_lea.vmem %s734_s11, 768 }
  0x71   : > { %p736_p5 = scmp.lt.s32.totalorder %s1039_s17, %s734_s11  ;;  %p737_p9 = scmp.lt.s32.totalorder %s735_s28, %s729_s27 }
  0x72   : > { %p732_p3 = pneg %p731_p2 }
  0x73   : > { %552 = vmatpush3.bf16.msra.mxu0 %v639_v2  ;;  %p738_p12 = por %p737_p9, %p736_p5 }
  0x74   : > { %553 = vmatprep.subr.bf16.mxu0 %v640_v4 }
  0x75   : > { %p739_p1 = pnand %p738_p12, %p732_p3 }
  0x77   : > { %554 = vmatpush3.bf16.msra.mxu0 %v640_v4 }
  0x7a   : > { %556 = vmatmul.mubr.msk.bf16.vlgmr.msra.gmra.mrb[0].mxu0 %vm323_vm0, %v642_v5 }
 0x14d   : > { %v557_v12 = vpop.f32.mrb[0].mxu0 }
 0x14e   : > { %v373_v14 = vadd.f32 %v557_v12, %v528_v8  ;;  %v364_v15 = vpop.f32.mrb[1].mxu0 }
 0x14f   : > { %v365_v16 = vadd.f32 %v528_v8, %v364_v15  ;;  %v558_v18 = vpop.f32.mrb[2].mxu0 }
 0x150   : > { %v403_v19 = vadd.f32 %v388_v13, %v373_v14  ;;  %v367_v20 = vpop.f32.mrb[3].mxu0 }
 0x151   : > { %v401_v22 = vadd.f32 %v386_v11, %v365_v16  ;;  %v368_v23 = vadd.f32 %v528_v8, %v367_v20 }
 0x152   : > { %v406_v24 = vsel %vm400_vm1, %v403_v19, 0.0 }
 0x153   : > { %412 = vst [vmem:[%s271_s14 + $0x10] sm:$0xff] %v406_v24  ;;  %v407_v25 = vsel %vm382_vm2, %v395_v17, %v401_v22  ;;  %v402_v26 = vadd.f32 %v387_v21, %v368_v23 }
 0x154   : > { %410 = vst [vmem:[%s271_s14] sm:$0xff] %v407_v25 }
 0x155   : > { %411 = vst [vmem:[%s271_s14 + $0x8] sm:$0xff] %v402_v26 }
 0x156   : > { %742 = shalt.err (!%p739_p1)
}
 0x157   : > { %s743_s24 = scalar_lea.hbm %s1044_s22, 384  ;;  %s747_s10 = scalar_lea.hbm %s1093_s5, 768 }
 0x158   : > { %p744_p13 = scmp.ne.s32.totalorder %s1044_s22, %s743_s24  ;;  %p748_p4 = scmp.lt.u32.totalorder %s1044_s22, %s1093_s5 }
 0x159   : > { %p749_p7 = scmp.lt.u32.totalorder %s747_s10, %s743_s24  ;;  %p751_p8 = scmp.lt.u32.totalorder %s743_s24, %s1044_s22 }
 0x15a   : > { %p745_p6 = pnand %p744_p13, %p1109_p0 }
 0x15b   : > { %p750_p11 = por %p749_p7, %p748_p4 }
 0x15c   : > { %p746_p10 = pneg %p745_p6 }
 0x15d   : > { %p752_p2 = por %p751_p8, %p750_p11 }
 0x15f   : > { %p753_p3 = pnand %p752_p2, %p746_p10 }
 0x161   : > { %756 = shalt.err (!%p753_p3)
}
 0x162   : > { %s809_s29 = smov 128   ;;  %s810_s9 = smov 8  }
 0x163   : > { %574 = dma.vmem_to_hbm [thread:$0]  (%p1109_p0), %s1039_s17, 384, %s1044_s22, %s414_s15, %s809_s29, %s809_s29, %s810_s9  }
 0x164 PF: > { %s442_s13 = sand.u32 1, %s787_s18   ;;  %p1110_p5 = scmp.ne.s32.totalorder %s1099_s25, 0 }
 0x165   : > { %p1111_p9 = scmp.ge.s32.totalorder %s799_s21, 2  ;;  %s443_s27 = scalar_lea.sflag [#allocation4], %s442_s13 }
 0x167   : > { %p588_p12 = pnand %p1111_p9, %p1110_p5 }
 0x169   : > { %782 = dma.done.wait (!%p588_p12), %s443_s27, 384  }
 0x16a   : > { %784 = vsyncadd (!%p588_p12), %s443_s27, 4294966912  ;;  %p19_p1 = scmp.ge.s32.totalorder %s954_s23, 4   ;;  %s1112_s18 = smov %s791_s19 }
 0x16b   : > { %s1113_s19 = smov %s795_s20  ;;  %s1114_s20 = smov %s963_s7 }
 0x16c   : > { %s1115_s21 = smov %s954_s23  ;;  %21 = sbr.rel (!%p19_p1) target bundleno = 6 (0x6), region = 93 }
 0x173   :  { %448 = vsyncpa [#allocation3], 1 }
 0x174   :  { %450 = vsyncpa [#allocation3 + $0x1], 1 }
 0x175   :  { %451 = vsyncpa [#allocation6], 1 }
 0x176   :  { %452 = vsyncpa [#allocation4], 1 }
 0x177   :  { %454 = vsyncpa [#allocation4 + $0x1], 1 }

</bundles_post_ra>
